<compile_context>
chip_gen: v7x
topology: tpu7x:2x2x1
jax: 0.10.0
libtpu: 0.0.40
codegen_flags: <defaults>
</compile_context>

<pallas_src>
import functools
import math

import jax
import jax.numpy as jnp
from jax.experimental import pallas as pl
from jax.experimental.pallas import tpu as pltpu


def _ceil_to(x, m):
    return (x + m - 1) // m * m


# ------------------------------ Pallas kernels ------------------------------

def _mm_kernel(a_ref, b_ref, bias_ref, o_ref):
    acc = jnp.dot(a_ref[...], b_ref[...], preferred_element_type=jnp.float32)
    o_ref[...] = (acc + bias_ref[...]).astype(o_ref.dtype)


def _mm_pre_kernel(a_ref, s_ref, t_ref, b_ref, bias_ref, o_ref, *, slope):
    # Fused inference-BN affine + LeakyReLU/ReLU on the A tile (f32 VPU math),
    # then bf16 MXU matmul with f32 accumulation and fused bias add.
    a = a_ref[...].astype(jnp.float32) * s_ref[...] + t_ref[...]
    a = jnp.where(a > 0, a, slope * a)
    acc = jnp.dot(a.astype(jnp.bfloat16), b_ref[...],
                  preferred_element_type=jnp.float32)
    o_ref[...] = (acc + bias_ref[...]).astype(o_ref.dtype)


@functools.lru_cache(maxsize=None)
def _get_mm_fn(Mp, K, Np, TM, TN, slope, has_pre, out_dtype_name):
    grid = (Mp // TM, Np // TN)
    out_dtype = jnp.dtype(out_dtype_name)

    a_spec = pl.BlockSpec((TM, K), lambda i, j: (i, 0))
    kvec_spec = pl.BlockSpec((1, K), lambda i, j: (0, 0))
    b_spec = pl.BlockSpec((K, TN), lambda i, j: (0, j))
    bias_spec = pl.BlockSpec((1, TN), lambda i, j: (0, j))
    out_spec = pl.BlockSpec((TM, TN), lambda i, j: (i, j))

    if has_pre:
        kernel = functools.partial(_mm_pre_kernel, slope=slope)
        in_specs = [a_spec, kvec_spec, kvec_spec, b_spec, bias_spec]
    else:
        kernel = _mm_kernel
        in_specs = [a_spec, b_spec, bias_spec]

    # VMEM budget (double-buffered inputs + output).  Only raise the scoped
    # limit when the shape needs it, and stay well under 64 MiB for v7x.
    est = 2 * (TM * K * 2 + K * TN * 2 + TN * 4
               + (2 * K * 4 if has_pre else 0)
               + TM * TN * out_dtype.itemsize) + TM * TN * 4
    vmem_limit = None
    if est > 24 * 1024 * 1024:
        vmem_limit = min(int(est * 2), 56 * 1024 * 1024)

    fn = pl.pallas_call(
        kernel,
        out_shape=jax.ShapeDtypeStruct((Mp, Np), out_dtype),
        grid_spec=pl.GridSpec(grid=grid, in_specs=in_specs,
                              out_specs=out_spec),
        compiler_params=pltpu.CompilerParams(
            dimension_semantics=("parallel", "parallel"),
            vmem_limit_bytes=vmem_limit),
    )
    return jax.jit(fn)


def matmul_bias(a, b, bias=None, scale=None, shift=None, slope=0.2,
                out_dtype=jnp.bfloat16):
    """out = act(a*scale + shift) @ b + bias   (act = LeakyReLU(slope)).

    If `scale` is None the prologue is skipped (plain a @ b + bias).
    a: (M, K) bf16, b: (K, N) bf16; bias/scale/shift f32 vectors."""
    M, K = a.shape
    K2, N = b.shape
    assert K == K2
    # Shape-aware tiling: full-K block (no K grid axis / no K padding),
    # TM up to 512, N left unpadded when it fits a single lane tile.
    if M <= 512:
        TM = _ceil_to(max(M, 8), 8)
        Mp = TM
    else:
        TM = 512
        Mp = _ceil_to(M, TM)
    if N <= 128:
        TN = N
        Np = N
    else:
        TN = 128
        Np = _ceil_to(N, 128)

    if Mp != M:
        a = jnp.pad(a, ((0, Mp - M), (0, 0)))
    if Np != N:
        b = jnp.pad(b, ((0, 0), (0, Np - N)))
        if bias is not None:
            bias = jnp.pad(bias, (0, Np - N))
    if bias is None:
        bias2 = jnp.zeros((1, Np), jnp.float32)
    else:
        bias2 = bias.reshape(1, Np).astype(jnp.float32)

    has_pre = scale is not None
    fn = _get_mm_fn(Mp, K, Np, TM, TN, float(slope), has_pre,
                    jnp.dtype(out_dtype).name)
    if has_pre:
        out = fn(a.astype(jnp.bfloat16),
                 scale.reshape(1, K).astype(jnp.float32),
                 shift.reshape(1, K).astype(jnp.float32),
                 b.astype(jnp.bfloat16), bias2)
    else:
        out = fn(a.astype(jnp.bfloat16), b.astype(jnp.bfloat16), bias2)
    if Mp != M or Np != N:
        out = out[:M, :N]
    return out


# --------------------------- conv lowering (glue) ----------------------------

def _bn_affine(bn):
    scale = bn["gamma"] / jnp.sqrt(bn["var"] + 1e-5)
    shift = bn["beta"] - bn["mean"] * scale
    return scale, shift


def fused_conv2d(x, conv, stride, pad, pre_bn=None, pre_slope=0.2):
    """conv( act(bn(x)) ) if pre_bn is given, else conv(x).

    x: NHWC bf16.  conv["w"]: (Cout, Cin, kh, kw) f32, conv["b"]: (Cout,) or None.
    The preceding BatchNorm(inference stats) + LeakyReLU/ReLU is fused into the
    Pallas matmul prologue.  When spatial padding is needed, x is padded with
    the per-channel value that the fused affine+act maps to exactly 0, which
    matches PyTorch's zero-padding of the activated tensor."""
    w, bias = conv["w"], conv["b"]
    Cout, Cin, kh, kw = w.shape
    N, H, W, C = x.shape
    assert C == Cin

    scale = shift = None
    if pre_bn is not None:
        scale, shift = _bn_affine(pre_bn)

    if kh == 1 and kw == 1 and stride == 1 and pad == 0:
        # 1x1 conv: no im2col, no padding copy.
        a = x.reshape(N * H * W, C)
        Ho, Wo = H, W
        scale_k, shift_k = scale, shift
    else:
        if pad > 0:
            if pre_bn is not None:
                safe = jnp.where(scale == 0, 1.0, scale)
                neutral = jnp.where(scale == 0, 0.0, -shift / safe)
                xp = jnp.broadcast_to(
                    neutral.astype(x.dtype).reshape(1, 1, 1, C),
                    (N, H + 2 * pad, W + 2 * pad, C))
                xp = jax.lax.dynamic_update_slice(xp, x, (0, pad, pad, 0))
            else:
                xp = jnp.pad(x, ((0, 0), (pad, pad), (pad, pad), (0, 0)))
        else:
            xp = x
        Hp, Wp = H + 2 * pad, W + 2 * pad
        Ho = (Hp - kh) // stride + 1
        Wo = (Wp - kw) // stride + 1
        # TODO(synk): 3x3 taps are still materialized (single bf16 im2col
        # concat) rather than accumulated in-kernel over a tap grid axis.
        patches = []
        for di in range(kh):
            for dj in range(kw):
                patches.append(
                    xp[:, di:di + (Ho - 1) * stride + 1:stride,
                          dj:dj + (Wo - 1) * stride + 1:stride, :])
        a = jnp.concatenate(patches, axis=-1).reshape(N * Ho * Wo, kh * kw * C)
        if pre_bn is not None:
            scale_k = jnp.tile(scale, kh * kw)
            shift_k = jnp.tile(shift, kh * kw)
        else:
            scale_k = shift_k = None

    wmat = jnp.transpose(w, (2, 3, 1, 0)).reshape(kh * kw * Cin, Cout)
    out = matmul_bias(a, wmat, bias, scale=scale_k, shift=shift_k,
                      slope=pre_slope)
    return out.reshape(N, Ho, Wo, Cout)


# -------------------------------- parameters ---------------------------------

def _make_bn(key, c):
    k1, k2 = jax.random.split(key)
    return {"gamma": 1.0 + 0.1 * jax.random.normal(k1, (c,), jnp.float32),
            "beta": 0.1 * jax.random.normal(k2, (c,), jnp.float32),
            "mean": jnp.zeros((c,), jnp.float32),
            "var": jnp.ones((c,), jnp.float32)}


def _make_conv(key, cin, cout, k, bias):
    k1, k2 = jax.random.split(key)
    std = 1.0 / math.sqrt(cin * k * k)
    w = std * jax.random.normal(k1, (cout, cin, k, k), jnp.float32)
    b = (0.01 * jax.random.normal(k2, (cout,), jnp.float32)) if bias else None
    return {"w": w, "b": b}


def _make_dense_layer(key, inplace, growth_rate, bn_size):
    ks = jax.random.split(key, 4)
    return {"bn1": _make_bn(ks[0], inplace),
            "conv1": _make_conv(ks[1], inplace, bn_size * growth_rate, 1, False),
            "bn2": _make_bn(ks[2], bn_size * growth_rate),
            "conv2": _make_conv(ks[3], bn_size * growth_rate, growth_rate, 3, False)}


def make_udgan_down_block(key, input_down, output_down, max_nc, num_dense,
                          growth_rate, bn_size, outer=False):
    if output_down >= max_nc:
        output_down = max_nc
    ks = jax.random.split(key, 4 + num_dense)
    p = {"outer": outer,
         "bn": None if outer else _make_bn(ks[0], input_down),
         "conv": _make_conv(ks[1], input_down, output_down, 3, True),
         "dense": [_make_dense_layer(ks[4 + i],
                                     output_down + i * growth_rate,
                                     growth_rate, bn_size)
                   for i in range(num_dense)]}
    output_dense = output_down + growth_rate * num_dense
    p["trans"] = {"bn": _make_bn(ks[2], output_dense),
                  "conv": _make_conv(ks[3], output_dense,
                                     output_dense // 2, 1, False)}
    return p


# --------------------------------- forward -----------------------------------

def _dense_layer_fwd(p, x):
    # BN + LeakyReLU(0.2) + Conv1x1 (no bias)  -> fused into one kernel
    y = fused_conv2d(x, p["conv1"], stride=1, pad=0,
                     pre_bn=p["bn1"], pre_slope=0.2)
    # BN + LeakyReLU(0.2) + Conv3x3/pad1 (no bias) -> fused into one kernel
    y = fused_conv2d(y, p["conv2"], stride=1, pad=1,
                     pre_bn=p["bn2"], pre_slope=0.2)
    return jnp.concatenate([x, y], axis=-1)        # torch.cat(dim=1) in NHWC


def udgan_down_block_fwd(p, x):
    """x: NHWC bf16 -> NHWC bf16."""
    # convlayer: [BN + LeakyReLU(0.2) +] Conv 3x3 / stride 2 / pad 1 (bias)
    x = fused_conv2d(x, p["conv"], stride=2, pad=1,
                     pre_bn=None if p["outer"] else p["bn"], pre_slope=0.2)
    # dense block
    for lp in p["dense"]:
        x = _dense_layer_fwd(lp, x)
    # transition: BN + ReLU + Conv1x1 (no bias)
    x = fused_conv2d(x, p["trans"]["conv"], stride=1, pad=0,
                     pre_bn=p["trans"]["bn"], pre_slope=0.0)
    return x


def udgan_down_block_forward(params, img_nchw):
    """Public API: NCHW f32 in -> NCHW f32 out (NHWC bf16 internally)."""
    x = jnp.transpose(img_nchw, (0, 2, 3, 1)).astype(jnp.bfloat16)
    y = udgan_down_block_fwd(params, x)
    return jnp.transpose(y, (0, 3, 1, 2)).astype(jnp.float32)


# ----------------------------------- main ------------------------------------

if __name__ == "__main__":
    key = jax.random.PRNGKey(0)
    pkey, xkey = jax.random.split(key)

    # Small shapes consistent with the module's constructor.
    B, input_down, H, W = 2, 4, 16, 16
    output_down, max_nc = 8, 64
    num_dense, growth_rate, bn_size = 3, 4, 2

    params = make_udgan_down_block(pkey, input_down, output_down, max_nc,
                                   num_dense, growth_rate, bn_size,
                                   outer=False)
    img = jax.random.normal(xkey, (B, input_down, H, W), jnp.float32)

    fwd = jax.jit(lambda x: udgan_down_block_forward(params, x))
    out = jax.block_until_ready(fwd(img))

    out_c = (min(output_down, max_nc) + growth_rate * num_dense) // 2   # = 10
    assert out.shape == (B, out_c, H // 2, W // 2), out.shape
    assert bool(jnp.all(jnp.isfinite(out)))
    print("KERNEL_OK")
</pallas_src>

<mosaic_0001>
module attributes {stable_mosaic.version = 11 : i64} {
  func.func @_mm_pre_kernel(%arg0: i32, %arg1: i32, %arg2: memref<128x36xbf16, #tpu.memory_space<vmem>>, %arg3: memref<1x36xf32, #tpu.memory_space<vmem>>, %arg4: memref<1x36xf32, #tpu.memory_space<vmem>>, %arg5: memref<36x8xbf16, #tpu.memory_space<vmem>>, %arg6: memref<1x8xf32, #tpu.memory_space<vmem>>, %arg7: memref<128x8xbf16, #tpu.memory_space<vmem>>) attributes {dimension_semantics = [#tpu.dimension_semantics<parallel>, #tpu.dimension_semantics<parallel>], iteration_bounds = array<i64: 1, 1>, scalar_prefetch = 0 : i64, scratch_operands = 0 : i64, tpu.core_type = #tpu.core_type<tc>, window_params = [{transform_indices = @transform_0, window_bounds = array<i64: 128, 36>}, {pipeline_mode = #tpu.pipeline_mode<synchronous>, transform_indices = @transform_1, window_bounds = array<i64: 1, 36>}, {pipeline_mode = #tpu.pipeline_mode<synchronous>, transform_indices = @transform_2, window_bounds = array<i64: 1, 36>}, {transform_indices = @transform_3, window_bounds = array<i64: 36, 8>}, {transform_indices = @transform_4, window_bounds = array<i64: 1, 8>}, {transform_indices = @transform_5, window_bounds = array<i64: 128, 8>}]} {
    %c0 = arith.constant 0 : index
    %c0_0 = arith.constant 0 : index
    %0 = vector.load %arg2[%c0, %c0_0] : memref<128x36xbf16, #tpu.memory_space<vmem>>, vector<128x36xbf16>
    %1 = arith.extf %0 : vector<128x36xbf16> to vector<128x36xf32>
    %c0_1 = arith.constant 0 : index
    %c0_2 = arith.constant 0 : index
    %2 = vector.load %arg3[%c0_1, %c0_2] : memref<1x36xf32, #tpu.memory_space<vmem>>, vector<1x36xf32>
    %3 = vector.broadcast %2 : vector<1x36xf32> to vector<128x36xf32>
    %4 = arith.mulf %1, %3 : vector<128x36xf32>
    %c0_3 = arith.constant 0 : index
    %c0_4 = arith.constant 0 : index
    %5 = vector.load %arg4[%c0_3, %c0_4] : memref<1x36xf32, #tpu.memory_space<vmem>>, vector<1x36xf32>
    %6 = vector.broadcast %5 : vector<1x36xf32> to vector<128x36xf32>
    %7 = arith.addf %4, %6 : vector<128x36xf32>
    %cst = arith.constant 0.000000e+00 : f32
    %8 = vector.broadcast %cst : f32 to vector<128x36xf32>
    %9 = arith.cmpf ogt, %7, %8 : vector<128x36xf32>
    %cst_5 = arith.constant 2.000000e-01 : f32
    %10 = vector.broadcast %cst_5 : f32 to vector<128x36xf32>
    %11 = arith.mulf %10, %7 : vector<128x36xf32>
    %12 = arith.select %9, %7, %11 : vector<128x36xi1>, vector<128x36xf32>
    %13 = arith.truncf %12 : vector<128x36xf32> to vector<128x36xbf16>
    %c0_6 = arith.constant 0 : index
    %c0_7 = arith.constant 0 : index
    %14 = vector.load %arg5[%c0_6, %c0_7] : memref<36x8xbf16, #tpu.memory_space<vmem>>, vector<36x8xbf16>
    %cst_8 = arith.constant dense<0.000000e+00> : vector<128x8xf32>
    %15 = tpu.matmul %13, %14, %cst_8 {dimension_numbers = #tpu.dot_dimension_numbers<[1], [0], [0], [1], [0, 0, 1, 1], [], []>} : vector<128x36xbf16>, vector<36x8xbf16>, vector<128x8xf32> -> vector<128x8xf32>
    %c0_9 = arith.constant 0 : index
    %c0_10 = arith.constant 0 : index
    %16 = vector.load %arg6[%c0_9, %c0_10] : memref<1x8xf32, #tpu.memory_space<vmem>>, vector<1x8xf32>
    %17 = vector.broadcast %16 : vector<1x8xf32> to vector<128x8xf32>
    %18 = arith.addf %15, %17 : vector<128x8xf32>
    %19 = arith.truncf %18 : vector<128x8xf32> to vector<128x8xbf16>
    %c0_11 = arith.constant 0 : index
    %c0_12 = arith.constant 0 : index
    %20 = vector.load %arg7[%c0_11, %c0_12] : memref<128x8xbf16, #tpu.memory_space<vmem>>, vector<128x8xbf16>
    tpu.vector_store %arg7[%c0_11, %c0_12], %19 {strides = array<i32>} : memref<128x8xbf16, #tpu.memory_space<vmem>>, vector<128x8xbf16>,
    return
  }
  func.func @transform_0(%arg0: i32, %arg1: i32) -> (i32, i32) {
    %c0_i32 = arith.constant 0 : i32
    %c0_i32_0 = arith.constant 0 : i32
    return %arg0, %c0_i32 : i32, i32
  }
  func.func @transform_1(%arg0: i32, %arg1: i32) -> (i32, i32) {
    %c0_i32 = arith.constant 0 : i32
    %c0_i32_0 = arith.constant 0 : i32
    %c0_i32_1 = arith.constant 0 : i32
    return %c0_i32, %c0_i32_0 : i32, i32
  }
  func.func @transform_2(%arg0: i32, %arg1: i32) -> (i32, i32) {
    %c0_i32 = arith.constant 0 : i32
    %c0_i32_0 = arith.constant 0 : i32
    %c0_i32_1 = arith.constant 0 : i32
    return %c0_i32, %c0_i32_0 : i32, i32
  }
  func.func @transform_3(%arg0: i32, %arg1: i32) -> (i32, i32) {
    %c0_i32 = arith.constant 0 : i32
    %c0_i32_0 = arith.constant 0 : i32
    return %c0_i32, %arg1 : i32, i32
  }
  func.func @transform_4(%arg0: i32, %arg1: i32) -> (i32, i32) {
    %c0_i32 = arith.constant 0 : i32
    %c0_i32_0 = arith.constant 0 : i32
    return %c0_i32, %arg1 : i32, i32
  }
  func.func @transform_5(%arg0: i32, %arg1: i32) -> (i32, i32) {
    %c0_i32 = arith.constant 0 : i32
    return %arg0, %arg1 : i32, i32
  }
}

</mosaic_0001>

<bundles_post_ra>
// kernel: tpu_custom_call.1
= control target key start
LH: loop header
LB: loop body
LE: loop exit
PB: predicated region body
PF: predicated region fallthrough
CT: control target
= control target key end

     0   :  { %vm207_vm0 = vcmask 1041408   ;;  %vm182_vm1 = vcmask 293888   ;;  %s705_s3 = inlined_call_operand.vmem [shape: bf16[36,8], index: 3, kind: input, shape index: {}]   ;;  %s706_s0 = inlined_call_operand.vmem [shape: bf16[128,36], index: 0, kind: input, shape index: {}]   ;;  %s707_s1 = inlined_call_operand.vmem [shape: f32[1,36], index: 1, kind: input, shape index: {}]   ;;  %s708_s2 = inlined_call_operand.vmem [shape: f32[1,36], index: 2, kind: input, shape index: {}]   ;;  %s709_s4 = inlined_call_operand.vmem [shape: f32[1,8], index: 4, kind: input, shape index: {}]   ;;  %s710_s5 = inlined_call_operand.vmem [shape: bf16[128,8], index: 5, kind: output, shape index: {}]  }
   0x1   :  { %v519_v0 = vld [vmem:[%s705_s3] sm:$0xff]   ;;  %v520_v1 = vld [vmem:[%s705_s3 + $0x8] sm:$0xff]   ;;  %v521_v2 = vld [vmem:[%s705_s3 + $0x10] ss:$0 sps:$4 sm:$0x33]  }
   0x2   :  { %489 = vmatprep.subr.bf16.mxu0 %v519_v0  ;;  %511 = vmatprep.subr.bf16.mxu1 %v519_v0  ;;  %v440_v3 = vld [vmem:[%s706_s0] sm:$0xff]   ;;  %v209_v9 = vsel %vm207_vm0, %v521_v2, 0  ;;  %v471_v12 = vld [vmem:[%s706_s0 + $0x8] sm:$0xff]   ;;  %v472_v14 = vld [vmem:[%s706_s0 + $0x10] sm:$0xff]  }
   0x3   :  { %490 = vmatpush3.bf16.msra.mxu0 %v519_v0  ;;  %514 = vmatpush3.bf16.msra.mxu1 %v519_v0  ;;  %v441_v4 = vunpack.c.l.bf16 %v440_v3  ;;  %v442_v5 = vunpack.c.h.bf16 %v440_v3  ;;  %v567_v6 = vld [vmem:[%s707_s1] ss:$0 sm:$0xff]  ;;  %v475_v13 = vld [vmem:[%s706_s0 + $0x28] sm:$0xff]   ;;  %v445_v17 = vunpack.c.l.bf16 %v471_v12  ;;  %v446_v18 = vunpack.c.h.bf16 %v471_v12  ;;  %v476_v31 = vld [vmem:[%s706_s0 + $0x30] sm:$0xff]  }
   0x4   :  { %v572_v7 = vld [vmem:[%s708_s2] ss:$0 sm:$0xff]  ;;  %491 = vmatprep.subr.bf16.mxu0 %v520_v1  ;;  %512 = vmatprep.subr.bf16.mxu1 %v520_v1  ;;  %v461_v21 = vunpack.c.l.bf16 %v475_v13  ;;  %v462_v22 = vunpack.c.h.bf16 %v475_v13  ;;  %v449_v26 = vunpack.c.l.bf16 %v472_v14  ;;  %v450_v30 = vunpack.c.h.bf16 %v472_v14  ;;  %v473_v61 = vld [vmem:[%s706_s0 + $0x18] sm:$0xff]  }
   0x5   :  { %v474_v8 = vld [vmem:[%s706_s0 + $0x20] sm:$0xff]   ;;  %v60_v15 = vmul.f32 %v441_v4, %v567_v6  ;;  %v61_v16 = vmul.f32 %v442_v5, %v567_v6  ;;  %v62_v25 = vmul.f32 %v445_v17, %v567_v6  ;;  %v63_v29 = vmul.f32 %v446_v18, %v567_v6 }
   0x6   :  { %v457_v10 = vunpack.c.l.bf16 %v474_v8  ;;  %v458_v11 = vunpack.c.h.bf16 %v474_v8  ;;  %v465_v39 = vunpack.c.l.bf16 %v476_v31  ;;  %v70_v46 = vmul.f32 %v461_v21, %v567_v6 }
   0x7   :  { %492 = vmatpush3.bf16.msra.mxu0 %v520_v1  ;;  %515 = vmatpush3.bf16.msra.mxu1 %v520_v1  ;;  %v83_v23 = vadd.f32 %v572_v7, %v60_v15  ;;  %v84_v24 = vadd.f32 %v572_v7, %v61_v16  ;;  %v85_v38 = vadd.f32 %v572_v7, %v62_v25  ;;  %v466_v53 = vunpack.c.h.bf16 %v476_v31 }
   0x8   :  { %v68_v19 = vmul.f32 %v457_v10, %v567_v6  ;;  %v69_v20 = vmul.f32 %v458_v11, %v567_v6  ;;  %517 = vmatprep.subr.msk.bf16.mxu0 %vm207_vm0, %v521_v2  ;;  %518 = vmatprep.subr.msk.bf16.mxu1 %vm207_vm0, %v521_v2  ;;  %v86_v43 = vadd.f32 %v572_v7, %v63_v29  ;;  %v453_v8 = vunpack.c.l.bf16 %v473_v61 }
   0x9   :  { %vm99_vm2 = vcmp.gt.f32.partialorder %v83_v23, 0.0  ;;  %vm100_vm3 = vcmp.gt.f32.partialorder %v84_v24, 0.0  ;;  %v115_v32 = vmul.f32 0.2, %v83_v23  ;;  %v116_v33 = vmul.f32 0.2, %v84_v24 }
   0xa   :  { %v91_v27 = vadd.f32 %v572_v7, %v68_v19  ;;  %v92_v28 = vadd.f32 %v572_v7, %v69_v20  ;;  %vm101_vm6 = vcmp.gt.f32.partialorder %v85_v38, 0.0  ;;  %v117_v45 = vmul.f32 0.2, %v85_v38 }
   0xb   :  { %494 = vmatpush3.bf16.msra.mxu0 %v209_v9  ;;  %516 = vmatpush3.bf16.msra.mxu1 %v209_v9  ;;  %v131_v36 = vsel %vm99_vm2, %v83_v23, %v115_v32  ;;  %v132_v37 = vsel %vm100_vm3, %v84_v24, %v116_v33  ;;  %vm102_vm7 = vcmp.gt.f32.partialorder %v86_v43, 0.0  ;;  %v118_v47 = vmul.f32 0.2, %v86_v43  ;;  %v477_v9 = vld [vmem:[%s706_s0 + $0x38] sm:$0xff]  }
   0xc   :  { %vm107_vm4 = vcmp.gt.f32.partialorder %v91_v27, 0.0  ;;  %vm108_vm5 = vcmp.gt.f32.partialorder %v92_v28, 0.0  ;;  %v123_v34 = vmul.f32 0.2, %v91_v27  ;;  %v124_v35 = vmul.f32 0.2, %v92_v28 }
   0xd   :  { %v147_v40 = vpack.c.bf16 %v132_v37, %v131_v36  ;;  %v71_v48 = vmul.f32 %v462_v22, %v567_v6  ;;  %v64_v49 = vmul.f32 %v449_v26, %v567_v6  ;;  %v133_v50 = vsel %vm101_vm6, %v85_v38, %v117_v45 }
   0xe   :  { %v139_v41 = vsel %vm107_vm4, %v91_v27, %v123_v34  ;;  %v140_v42 = vsel %vm108_vm5, %v92_v28, %v124_v35  ;;  %v93_v51 = vadd.f32 %v572_v7, %v70_v46  ;;  %v65_v52 = vmul.f32 %v450_v30, %v567_v6 }
   0xf   :  { %v151_v44 = vpack.c.bf16 %v140_v42, %v139_v41  ;;  %495 = vmatprep.mubr.msk.bf16.mxu0 %vm182_vm1, %v147_v40  ;;  %v134_v54 = vsel %vm102_vm7, %v86_v43, %v118_v47  ;;  %v94_v55 = vadd.f32 %v572_v7, %v71_v48  ;;  %v87_v56 = vadd.f32 %v572_v7, %v64_v49 }
  0x10   :  { %v72_v57 = vmul.f32 %v465_v39, %v567_v6  ;;  %v148_v58 = vpack.c.bf16 %v134_v54, %v133_v50  ;;  %vm109_vm8 = vcmp.gt.f32.partialorder %v93_v51, 0.0  ;;  %v125_v59 = vmul.f32 0.2, %v93_v51  ;;  %v395_v39 = vld [vmem:[%s709_s4] ss:$0 sm:$0xff] }
  0x11   :  { %503 = vmatprep.mubr.msk.bf16.mxu1 %vm182_vm1, %v151_v44  ;;  %v88_v60 = vadd.f32 %v572_v7, %v65_v52  ;;  %vm110_vm9 = vcmp.gt.f32.partialorder %v94_v55, 0.0  ;;  %v126_v62 = vmul.f32 0.2, %v94_v55  ;;  %vm103_vm10 = vcmp.gt.f32.partialorder %v87_v56, 0.0 }
  0x12   :  { %v119_v63 = vmul.f32 0.2, %v87_v56  ;;  %496 = vmatmul.mubr.msk.bf16.vlgmr.msra.gmra.mrb[0].mxu0 %vm182_vm1, %v148_v58  ;;  %v141_v0 = vsel %vm109_vm8, %v93_v51, %v125_v59  ;;  %v73_v2 = vmul.f32 %v466_v53, %v567_v6  ;;  %v95_v5 = vadd.f32 %v572_v7, %v72_v57 }
  0x13   :  { %vm104_vm11 = vcmp.gt.f32.partialorder %v88_v60, 0.0  ;;  %v120_v1 = vmul.f32 0.2, %v88_v60  ;;  %v142_v3 = vsel %vm110_vm9, %v94_v55, %v126_v62  ;;  %v454_v13 = vunpack.c.h.bf16 %v473_v61 }
  0x14   :  { %v135_v4 = vsel %vm103_vm10, %v87_v56, %v119_v63  ;;  %v152_v10 = vpack.c.bf16 %v142_v3, %v141_v0  ;;  %v96_v12 = vadd.f32 %v572_v7, %v73_v2  ;;  %vm111_vm12 = vcmp.gt.f32.partialorder %v95_v5, 0.0 }
  0x15   :  { %v136_v11 = vsel %vm104_vm11, %v88_v60, %v120_v1  ;;  %v127_v15 = vmul.f32 0.2, %v95_v5  ;;  %v66_v16 = vmul.f32 %v453_v8, %v567_v6  ;;  %v67_v18 = vmul.f32 %v454_v13, %v567_v6 }
  0x16   :  { %v149_v14 = vpack.c.bf16 %v136_v11, %v135_v4  ;;  %504 = vmatmul.mubr.msk.bf16.vlgmr.msra.gmra.mrb[0].mxu1 %vm182_vm1, %v152_v10  ;;  %vm112_vm13 = vcmp.gt.f32.partialorder %v96_v12, 0.0  ;;  %v128_v17 = vmul.f32 0.2, %v96_v12  ;;  %v469_v19 = vunpack.c.l.bf16 %v477_v9 }
  0x17   :  { %v143_v20 = vsel %vm111_vm12, %v95_v5, %v127_v15  ;;  %v89_v21 = vadd.f32 %v572_v7, %v66_v16  ;;  %v470_v22 = vunpack.c.h.bf16 %v477_v9  ;;  %v90_v24 = vadd.f32 %v572_v7, %v67_v18 }
  0x18   :  { %499 = vmatprep.mubr.msk.bf16.mxu0 %vm182_vm1, %v149_v14  ;;  %v144_v23 = vsel %vm112_vm13, %v96_v12, %v128_v17  ;;  %v74_v25 = vmul.f32 %v469_v19, %v567_v6  ;;  %vm372_vm3 = vcmask 60416  }
  0x19   :  { %v153_v26 = vpack.c.bf16 %v144_v23, %v143_v20  ;;  %vm105_vm14 = vcmp.gt.f32.partialorder %v89_v21, 0.0  ;;  %v121_v27 = vmul.f32 0.2, %v89_v21  ;;  %v75_v28 = vmul.f32 %v470_v22, %v567_v6 }
  0x1a   :  { %vm106_vm15 = vcmp.gt.f32.partialorder %v90_v24, 0.0  ;;  %v122_v29 = vmul.f32 0.2, %v90_v24  ;;  %v97_v30 = vadd.f32 %v572_v7, %v74_v25 }
  0x1b   :  { %507 = vmatprep.mubr.msk.bf16.mxu1 %vm182_vm1, %v153_v26  ;;  %v137_v31 = vsel %vm105_vm14, %v89_v21, %v121_v27  ;;  %v98_v32 = vadd.f32 %v572_v7, %v75_v28 }
  0x1c   :  { %v138_v33 = vsel %vm106_vm15, %v90_v24, %v122_v29  ;;  %vm113_vm0 = vcmp.gt.f32.partialorder %v97_v30, 0.0  ;;  %v129_v34 = vmul.f32 0.2, %v97_v30 }
  0x1d   :  { %v150_v35 = vpack.c.bf16 %v138_v33, %v137_v31  ;;  %vm114_vm2 = vcmp.gt.f32.partialorder %v98_v32, 0.0  ;;  %v130_v36 = vmul.f32 0.2, %v98_v32 }
  0x1e   :  { %v145_v37 = vsel %vm113_vm0, %v97_v30, %v129_v34 }
  0x1f   :  { %500 = vmatmul.mubr.msk.bf16.gmra.mrb[4].mxu0 %vm182_vm1, %v150_v35  ;;  %v146_v38 = vsel %vm114_vm2, %v98_v32, %v130_v36 }
  0x20   :  { %v154_v6 = vpack.c.bf16 %v146_v38, %v145_v37 }
  0x22   :  { %508 = vmatmul.mubr.msk.bf16.gmra.mrb[4].mxu1 %vm182_vm1, %v154_v6 }
  0xe5   :  { %v497_v40 = vpop.f32.mrb[0].mxu0 }
  0xe6   :  { %v254_v41 = vadd.f32 %v497_v40, %v395_v39  ;;  %v245_v7 = vpop.f32.mrb[1].mxu0 }
  0xe7   :  { %v246_v42 = vadd.f32 %v395_v39, %v245_v7  ;;  %v498_v43 = vpop.f32.mrb[2].mxu0 }
  0xe8   :  { %v425_v44 = vpack.c.bf16 %v254_v41, %v254_v41  ;;  %v257_v45 = vadd.f32 %v498_v43, %v395_v39  ;;  %v248_v46 = vpop.f32.mrb[3].mxu0 }
  0xe9   :  { %v505_v47 = vpop.f32.mrb[0].mxu1  ;;  %v423_v48 = vpack.c.bf16 %v246_v42, %v246_v42  ;;  %v249_v49 = vadd.f32 %v395_v39, %v248_v46 }
  0xea   :  { %375 = vst.msk [vmem:[%s710_s5 + $0x8] sm:$0xf] %vm372_vm3, %v425_v44  ;;  %v286_v50 = vadd.f32 %v505_v47, %v395_v39  ;;  %v277_v51 = vpop.f32.mrb[1].mxu1  ;;  %v426_v52 = vpack.c.bf16 %v257_v45, %v257_v45 }
  0xeb   :  { %373 = vst.msk [vmem:[%s710_s5] sm:$0xf] %vm372_vm3, %v423_v48  ;;  %v278_v53 = vadd.f32 %v395_v39, %v277_v51  ;;  %v506_v54 = vpop.f32.mrb[2].mxu1  ;;  %v424_v55 = vpack.c.bf16 %v249_v49, %v249_v49 }
  0xec   :  { %v433_v56 = vpack.c.bf16 %v286_v50, %v286_v50  ;;  %376 = vst.msk [vmem:[%s710_s5 + $0xc] sm:$0xf] %vm372_vm3, %v426_v52  ;;  %v289_v57 = vadd.f32 %v506_v54, %v395_v39  ;;  %v280_v58 = vpop.f32.mrb[3].mxu1 }
  0xed   :  { %v431_v59 = vpack.c.bf16 %v278_v53, %v278_v53  ;;  %374 = vst.msk [vmem:[%s710_s5 + $0x4] sm:$0xf] %vm372_vm3, %v424_v55  ;;  %v281_v60 = vadd.f32 %v395_v39, %v280_v58 }
  0xee   :  { %383 = vst.msk [vmem:[%s710_s5 + $0x28] sm:$0xf] %vm372_vm3, %v433_v56  ;;  %v434_v61 = vpack.c.bf16 %v289_v57, %v289_v57 }
  0xef   :  { %381 = vst.msk [vmem:[%s710_s5 + $0x20] sm:$0xf] %vm372_vm3, %v431_v59  ;;  %v432_v62 = vpack.c.bf16 %v281_v60, %v281_v60 }
  0xf0   :  { %384 = vst.msk [vmem:[%s710_s5 + $0x2c] sm:$0xf] %vm372_vm3, %v434_v61 }
  0xf1   :  { %382 = vst.msk [vmem:[%s710_s5 + $0x24] sm:$0xf] %vm372_vm3, %v432_v62 }
  0xf2   :  { %v501_v63 = vpop.f32.mrb[4].mxu0 }
  0xf3   :  { %v270_v0 = vadd.f32 %v501_v63, %v395_v39  ;;  %v261_v1 = vpop.f32.mrb[5].mxu0 }
  0xf4   :  { %v262_v2 = vadd.f32 %v395_v39, %v261_v1  ;;  %v502_v3 = vpop.f32.mrb[6].mxu0 }
  0xf5   :  { %v429_v4 = vpack.c.bf16 %v270_v0, %v270_v0  ;;  %v509_v5 = vpop.f32.mrb[4].mxu1  ;;  %v273_v8 = vadd.f32 %v502_v3, %v395_v39  ;;  %v264_v9 = vpop.f32.mrb[7].mxu0 }
  0xf6   :  { %v302_v10 = vadd.f32 %v509_v5, %v395_v39  ;;  %v427_v11 = vpack.c.bf16 %v262_v2, %v262_v2  ;;  %v293_v12 = vpop.f32.mrb[5].mxu1  ;;  %v265_v13 = vadd.f32 %v395_v39, %v264_v9 }
  0xf7   :  { %379 = vst.msk [vmem:[%s710_s5 + $0x18] sm:$0xf] %vm372_vm3, %v429_v4  ;;  %v294_v14 = vadd.f32 %v395_v39, %v293_v12  ;;  %v430_v15 = vpack.c.bf16 %v273_v8, %v273_v8  ;;  %v510_v16 = vpop.f32.mrb[6].mxu1 }
  0xf8   :  { %v437_v17 = vpack.c.bf16 %v302_v10, %v302_v10  ;;  %377 = vst.msk [vmem:[%s710_s5 + $0x10] sm:$0xf] %vm372_vm3, %v427_v11  ;;  %v305_v18 = vadd.f32 %v510_v16, %v395_v39  ;;  %v428_v19 = vpack.c.bf16 %v265_v13, %v265_v13  ;;  %v296_v20 = vpop.f32.mrb[7].mxu1 }
  0xf9   :  { %v435_v21 = vpack.c.bf16 %v294_v14, %v294_v14  ;;  %380 = vst.msk [vmem:[%s710_s5 + $0x1c] sm:$0xf] %vm372_vm3, %v430_v15  ;;  %v297_v22 = vadd.f32 %v395_v39, %v296_v20 }
  0xfa   :  { %387 = vst.msk [vmem:[%s710_s5 + $0x38] sm:$0xf] %vm372_vm3, %v437_v17  ;;  %v438_v23 = vpack.c.bf16 %v305_v18, %v305_v18  ;;  %378 = vst.msk [vmem:[%s710_s5 + $0x14] sm:$0xf] %vm372_vm3, %v428_v19 }
  0xfb   :  { %385 = vst.msk [vmem:[%s710_s5 + $0x30] sm:$0xf] %vm372_vm3, %v435_v21  ;;  %v436_v24 = vpack.c.bf16 %v297_v22, %v297_v22 }
  0xfc   :  { %388 = vst.msk [vmem:[%s710_s5 + $0x3c] sm:$0xf] %vm372_vm3, %v438_v23 }
  0xfd   :  { %386 = vst.msk [vmem:[%s710_s5 + $0x34] sm:$0xf] %vm372_vm3, %v436_v24 }

</bundles_post_ra>
